<compile_context>
chip_gen: v6e
topology: v6e:2x2x1
jax: 0.10.0
libtpu: 0.0.40
codegen_flags: <defaults>
</compile_context>

<pallas_src>
import functools

import jax
import jax.numpy as jnp
from jax.experimental import pallas as pl
from jax.experimental.pallas import tpu as pltpu

# consts.TRIGGER_ANCHOR_NUM placeholder (not provided by the module)
TRIGGER_ANCHOR_NUM = 3

# hyperparameters (deterministic, in-script)
HYPS = {
    "dropout": 0.5,
    "gate_repr": False,   # -> "Bert-Feature cat CNN" branch
    "cat_hn": True,       # -> concat sentence_representation as well
    "ED_enable": False,   # -> zero losses / labels branch
}

# ~1.5 MiB of f32 output per tile at Dtot=384; 3 inputs + 1 output,
# double-buffered, stays well under the default scoped-VMEM limit on
# v5e/v6e/v7x, while being large enough to amortize the ~0.35 us step cost.
_MAX_ROWS_PER_TILE = 1024


def _hash_u32(x):
    """lowbias32 integer mixer (Chris Wellons). Pure VPU ops, portable."""
    x = x ^ (x >> jnp.uint32(16))
    x = x * jnp.uint32(0x7FEB352D)
    x = x ^ (x >> jnp.uint32(15))
    x = x * jnp.uint32(0x846CA68B)
    x = x ^ (x >> jnp.uint32(16))
    return x


def _concat_dropout_kernel(*refs, p, seed_key, seg_dims, d_total,
                           rows_per_tile):
    """Fused feature-concat + inverted dropout over one (rows, Dtot) tile."""
    out_ref = refs[-1]
    in_refs = refs[:-1]

    keep_prob = 1.0 - p
    # keep iff hash(counter) < thresh  (uint32 domain, single compare)
    thresh = jnp.uint32(min(int(round(keep_prob * 4294967296.0)), 0xFFFFFFFF))
    scale = jnp.float32(1.0 / keep_prob) if 0.0 < p < 1.0 else jnp.float32(1.0)

    # global row offset of this tile (grid axis 0 iterates row tiles)
    base_row = (pl.program_id(0) * rows_per_tile).astype(jnp.uint32)

    def dropout(x, col_off):
        if p <= 0.0:
            return x
        if p >= 1.0:
            return jnp.zeros_like(x)
        rows = jax.lax.broadcasted_iota(jnp.int32, x.shape, 0).astype(jnp.uint32)
        cols = jax.lax.broadcasted_iota(jnp.int32, x.shape, 1).astype(jnp.uint32)
        # unique per-element counter over the full (B*S, Dtot) output
        ctr = (base_row + rows) * jnp.uint32(d_total) + cols + jnp.uint32(col_off)
        bits = _hash_u32(ctr ^ jnp.uint32(seed_key))
        keep = bits < thresh
        return jnp.where(keep, x * scale, jnp.float32(0.0))

    segs = []
    off = 0
    for ref, d in zip(in_refs, seg_dims):
        segs.append(dropout(ref[...], off))
        off += d
    # single lane-dense store of the concatenated tile (Dtot multiple of 128
    # in the demo -> unmasked vst; also correct for non-aligned dims).
    out_ref[...] = segs[0] if len(segs) == 1 else jnp.concatenate(segs, axis=-1)


def reg_trigger_representation(word_repr, sent_repr, cnn_repr, *,
                               dropout_p, cat_hn, training, seed):
    B, S, _ = word_repr.shape
    inputs = [word_repr, sent_repr, cnn_repr] if cat_hn else [word_repr, cnn_repr]
    seg_dims = tuple(int(x.shape[-1]) for x in inputs)
    d_total = int(sum(seg_dims))
    n_rows = B * S

    # Flatten (B, S, D) -> (B*S, D): free row-major reshape; the kernel grids
    # over big row tiles so it is HBM-bandwidth bound, not step-overhead bound.
    flat = [x.reshape(n_rows, d) for x, d in zip(inputs, seg_dims)]

    if n_rows <= _MAX_ROWS_PER_TILE:
        rows = n_rows                      # single grid step for small shapes
    else:
        rows = _MAX_ROWS_PER_TILE          # multiple of 8 -> valid sub-block
    grid = (pl.cdiv(n_rows, rows),)

    p = float(dropout_p) if training else 0.0
    # seed baked in at trace time (no scalar-prefetch / SMEM plumbing needed)
    seed_key = (int(seed) * 0x9E3779B9 + 0x85EBCA6B) & 0xFFFFFFFF

    kernel = functools.partial(
        _concat_dropout_kernel, p=p, seed_key=seed_key, seg_dims=seg_dims,
        d_total=d_total, rows_per_tile=rows)

    out = pl.pallas_call(
        kernel,
        out_shape=jax.ShapeDtypeStruct((n_rows, d_total), jnp.float32),
        grid=grid,
        in_specs=[pl.BlockSpec((rows, d), lambda i: (i, 0)) for d in seg_dims],
        out_specs=pl.BlockSpec((rows, d_total), lambda i: (i, 0)),
        compiler_params=pltpu.CompilerParams(
            dimension_semantics=("parallel",)),
    )(*flat)
    return out.reshape(B, S, d_total)


def event_detection_forward(seq_mask, cnn_representation, word_representation,
                            sentence_representation, trigger_anchor_labels,
                            *, hyps=HYPS, training=True, seed=0):
    """Mirrors EventDetectionLayer.forward for the branch that only relies on
    parameters created in __init__ (gate_repr=False, ED_enable=False)."""
    B, S = seq_mask.shape[:2]

    zero_loss = jnp.zeros([1], jnp.float32)
    # torch uses int64; JAX x64 is off by default, so int32 here
    zero_label = jnp.zeros([B, S, TRIGGER_ANCHOR_NUM], jnp.int32)

    # hot path: Pallas kernel
    reg_trigger_repr = reg_trigger_representation(
        word_representation, sentence_representation, cnn_representation,
        dropout_p=hyps["dropout"], cat_hn=hyps["cat_hn"],
        training=training, seed=seed)

    # ED_enable == False branch
    loss_ed, detect_label = zero_loss, zero_label
    loss_ed_cls, cls_label = zero_loss, zero_label
    # torch.nonzero(trigger_anchor_labels != -1) -> static-size argwhere
    n_anchor = B * S * TRIGGER_ANCHOR_NUM
    candidates_idx = jnp.argwhere(trigger_anchor_labels != -1,
                                  size=n_anchor, fill_value=-1)

    # TODO(synk): self.trigger_candidates_layer / trigger_detection_layer /
    # trigger_classification_layer / reg_gate_cnn_repr / linear_hn / bn_h are
    # referenced in forward() but never defined in __init__, so their outputs
    # cannot be reproduced; return zero/None placeholders of plausible shape.
    trigger_candidates_repr = None
    trigger_candidates_label = jnp.zeros([B, S], jnp.int32)
    trigger_candidates_predict = jnp.zeros(trigger_candidates_label.shape,
                                           jnp.float32)
    trigger_candidates_num = jnp.zeros([B], jnp.int32)
    trigger_candidates_len = jnp.zeros([B], jnp.int32)
    trigger_candidates_mask = jnp.zeros([B, S], jnp.float32)
    trigger_candidates_loc = candidates_idx
    trigger_candidates_weight = [{} for _ in range(B)]
    key_candidate_att_repr = None

    return (loss_ed, detect_label, loss_ed_cls, cls_label,
            reg_trigger_repr, trigger_candidates_repr,
            trigger_candidates_label, trigger_candidates_predict,
            trigger_candidates_num, trigger_candidates_len,
            trigger_candidates_mask, trigger_candidates_loc,
            trigger_candidates_weight, key_candidate_att_repr)


if __name__ == "__main__":
    key = jax.random.PRNGKey(0)
    k1, k2, k3, k4 = jax.random.split(key, 4)

    B, S = 2, 8
    D_WORD, D_SENT, D_CNN = 128, 128, 128   # lane-aligned feature dims

    seq_mask = jnp.ones((B, S), jnp.float32)
    cnn_representation = jax.random.normal(k1, (B, S, D_CNN), jnp.float32)
    word_representation = jax.random.normal(k2, (B, S, D_WORD), jnp.float32)
    sentence_representation = jax.random.normal(k3, (B, S, D_SENT), jnp.float32)
    trigger_anchor_labels = jax.random.randint(
        k4, (B, S, TRIGGER_ANCHOR_NUM), -1, 2, jnp.int32)

    # eval-mode (p effectively 0): kernel output must equal plain concat exactly
    eval_repr = reg_trigger_representation(
        word_representation, sentence_representation, cnn_representation,
        dropout_p=HYPS["dropout"], cat_hn=HYPS["cat_hn"],
        training=False, seed=0)
    ref = jnp.concatenate(
        [word_representation, sentence_representation, cnn_representation], -1)
    jax.block_until_ready(eval_repr)
    assert jnp.allclose(eval_repr, ref), "eval-mode concat mismatch"

    outs = event_detection_forward(
        seq_mask, cnn_representation, word_representation,
        sentence_representation, trigger_anchor_labels,
        hyps=HYPS, training=True, seed=0)

    reg_repr = outs[4]
    jax.block_until_ready(reg_repr)
    assert reg_repr.shape == (B, S, D_WORD + D_SENT + D_CNN)
    assert reg_repr.dtype == jnp.float32
    # inverted-dropout sanity: surviving entries are exactly concat * 1/(1-p)
    nz = reg_repr != 0
    assert jnp.allclose(jnp.where(nz, reg_repr, 0.0),
                        jnp.where(nz, ref * 2.0, 0.0), rtol=1e-6, atol=1e-6)
    print("KERNEL_OK")
</pallas_src>

<mosaic_0001>
module attributes {stable_mosaic.version = 11 : i64} {
  func.func @_concat_dropout_kernel(%arg0: i32, %arg1: memref<16x128xf32, #tpu.memory_space<vmem>>, %arg2: memref<16x128xf32, #tpu.memory_space<vmem>>, %arg3: memref<16x128xf32, #tpu.memory_space<vmem>>, %arg4: memref<16x384xf32, #tpu.memory_space<vmem>>) attributes {dimension_semantics = [#tpu.dimension_semantics<parallel>], iteration_bounds = array<i64: 1>, scalar_prefetch = 0 : i64, scratch_operands = 0 : i64, tpu.core_type = #tpu.core_type<tc>, window_params = [{transform_indices = @transform_0, window_bounds = array<i64: 16, 128>}, {transform_indices = @transform_1, window_bounds = array<i64: 16, 128>}, {transform_indices = @transform_2, window_bounds = array<i64: 16, 128>}, {transform_indices = @transform_3, window_bounds = array<i64: 16, 384>}]} {
    %c0 = arith.constant 0 : index
    %c0_0 = arith.constant 0 : index
    %0 = vector.load %arg1[%c0, %c0_0] : memref<16x128xf32, #tpu.memory_space<vmem>>, vector<16x128xf32>
    %c0_1 = arith.constant 0 : index
    %c0_2 = arith.constant 0 : index
    %1 = vector.load %arg2[%c0_1, %c0_2] : memref<16x128xf32, #tpu.memory_space<vmem>>, vector<16x128xf32>
    %c0_3 = arith.constant 0 : index
    %c0_4 = arith.constant 0 : index
    %2 = vector.load %arg3[%c0_3, %c0_4] : memref<16x128xf32, #tpu.memory_space<vmem>>, vector<16x128xf32>
    %3 = tpu.concatenate %0, %1, %2 in 1 : vector<16x128xf32>, vector<16x128xf32>, vector<16x128xf32> -> vector<16x384xf32>
    %c0_5 = arith.constant 0 : index
    %c0_6 = arith.constant 0 : index
    %4 = vector.load %arg4[%c0_5, %c0_6] : memref<16x384xf32, #tpu.memory_space<vmem>>, vector<16x384xf32>
    tpu.vector_store %arg4[%c0_5, %c0_6], %3 {strides = array<i32>} : memref<16x384xf32, #tpu.memory_space<vmem>>, vector<16x384xf32>,
    return
  }
  func.func @transform_0(%arg0: i32) -> (i32, i32) {
    %c0_i32 = arith.constant 0 : i32
    %c0_i32_0 = arith.constant 0 : i32
    return %arg0, %c0_i32 : i32, i32
  }
  func.func @transform_1(%arg0: i32) -> (i32, i32) {
    %c0_i32 = arith.constant 0 : i32
    %c0_i32_0 = arith.constant 0 : i32
    return %arg0, %c0_i32 : i32, i32
  }
  func.func @transform_2(%arg0: i32) -> (i32, i32) {
    %c0_i32 = arith.constant 0 : i32
    %c0_i32_0 = arith.constant 0 : i32
    return %arg0, %c0_i32 : i32, i32
  }
  func.func @transform_3(%arg0: i32) -> (i32, i32) {
    %c0_i32 = arith.constant 0 : i32
    %c0_i32_0 = arith.constant 0 : i32
    return %arg0, %c0_i32 : i32, i32
  }
}

</mosaic_0001>

<bundles_post_ra>
// kernel: tpu_custom_call.1
= control target key start
LH: loop header
LB: loop body
LE: loop exit
PB: predicated region body
PF: predicated region fallthrough
CT: control target
= control target key end

     0   :  { %8 = vsyncpa [#allocation3], 0  ;;  %s220_s0 = inlined_call_operand.hbm [shape: f32[16,128], index: 0, kind: input, shape index: {}]   ;;  %s221_s1 = inlined_call_operand.hbm [shape: f32[16,128], index: 1, kind: input, shape index: {}]   ;;  %s222_s2 = inlined_call_operand.hbm [shape: f32[16,128], index: 2, kind: input, shape index: {}]   ;;  %s223_s3 = inlined_call_operand.hbm [shape: f32[16,384], index: 3, kind: output, shape index: {}]  }
   0x1   :  { %9 = vsyncpa [#allocation6], 0 }
   0x2   :  { %10 = vsyncpa [#allocation4], 0  ;;  %s180_s12 = smov [#allocation5]   ;;  %s181_s14 = smov [#allocation2]  }
   0x3   :  { %s28_s13 = sshll.u32 %s180_s12, 4  ;;  %s16_s15 = sshll.u32 %s181_s14, 4  ;;  %s29_s13 = int_to_ptr.vmem [resolvable:$true] %s28_s13  ;;  %s17_s15 = int_to_ptr.vmem [resolvable:$true] %s16_s15 }
   0x4   :  { %s102_s16 = scalar_lea.vmem %s29_s13, 256  ;;  %p107_p1 = scmp.lt.s32.totalorder %s29_s13, %s29_s13 }
   0x5   :  { %p103_p0 = scmp.ne.s32.totalorder %s29_s13, %s102_s16  ;;  %p108_p2 = scmp.lt.s32.totalorder %s102_s16, %s102_s16 }
   0x7   :  { %p109_p3 = por %p108_p2, %p107_p1 }
   0x9   :  { %p110_p4 = pnand %p109_p3, %p103_p0 }
   0xb   :  { %113 = shalt.err (!%p110_p4)
}
   0xc   :  { %s182_s17 = smov 128   ;;  %s183_s18 = smov 8  }
   0xd   :  { %34 = dma.hbm_to_vmem [thread:$0]  %s221_s1, 256, %s29_s13, [#allocation6], %s182_s17, %s182_s17, %s183_s18  }
   0xe   :  { %s122_s21 = scalar_lea.vmem %s17_s15, 256  ;;  %p127_p6 = scmp.lt.s32.totalorder %s17_s15, %s17_s15 }
   0xf   :  { %p123_p5 = scmp.ne.s32.totalorder %s17_s15, %s122_s21  ;;  %p128_p7 = scmp.lt.s32.totalorder %s122_s21, %s122_s21 }
  0x11   :  { %p129_p8 = por %p128_p7, %p127_p6 }
  0x13   :  { %p130_p9 = pnand %p129_p8, %p123_p5 }
  0x15   :  { %133 = shalt.err (!%p130_p9)
}
  0x16   :  { %22 = dma.hbm_to_vmem [thread:$0]  %s220_s0, 256, %s17_s15, [#allocation3], %s182_s17, %s182_s17, %s183_s18  }
  0x17   :  { %s184_s24 = smov [#allocation7]  }
  0x18   :  { %s40_s25 = sshll.u32 %s184_s24, 4  ;;  %s41_s25 = int_to_ptr.vmem [resolvable:$true] %s40_s25 }
  0x19   :  { %s142_s26 = scalar_lea.vmem %s41_s25, 256  ;;  %p147_p11 = scmp.lt.s32.totalorder %s41_s25, %s41_s25 }
  0x1a   :  { %p143_p10 = scmp.ne.s32.totalorder %s41_s25, %s142_s26  ;;  %p148_p12 = scmp.lt.s32.totalorder %s142_s26, %s142_s26 }
  0x1c   :  { %p149_p13 = por %p148_p12, %p147_p11 }
  0x1e   :  { %p150_p0 = pnand %p149_p13, %p143_p10 }
  0x20   :  { %153 = shalt.err (!%p150_p0)
}
  0x21   :  { %46 = dma.hbm_to_vmem [thread:$0]  %s222_s2, 256, %s41_s25, [#allocation6], %s182_s17, %s182_s17, %s183_s18  }
  0x22   :  { %174 = dma.done.wait [#allocation3], 256  }
  0x23   :  { %175 = vsyncadd [#allocation3], 4294967040 }
  0x24   :  { %176 = dma.done.wait [#allocation6], 512  }
  0x25   :  { %177 = vsyncadd [#allocation6], 4294966784  ;;  %s185_s28 = smov [#allocation8]   ;;  %v56_v0 = vld [vmem:[#allocation2] sm:$0xff]  ;;  %v58_v1 = vld [vmem:[#allocation5] sm:$0xff] }
  0x26   :  { %s73_s0 = sshll.u32 %s185_s28, 4  ;;  %v60_v2 = vld [vmem:[#allocation7] sm:$0xff]  ;;  %62 = vst [vmem:[#allocation8] sm:$0xff] %v56_v0  ;;  %63 = vst [vmem:[#allocation8 + $0x8] sm:$0xff] %v58_v1  ;;  %v57_v3 = vld [vmem:[#allocation2 + $0x8] sm:$0xff]  ;;  %s74_s0 = int_to_ptr.vmem [resolvable:$true] %s73_s0 }
  0x27   :  { %64 = vst [vmem:[#allocation8 + $0x10] sm:$0xff] %v60_v2  ;;  %v59_v4 = vld [vmem:[#allocation5 + $0x8] sm:$0xff]  ;;  %v61_v5 = vld [vmem:[#allocation7 + $0x8] sm:$0xff]  ;;  %65 = vst [vmem:[#allocation8 + $0x18] sm:$0xff] %v57_v3  ;;  %s154_s2 = scalar_lea.vmem %s74_s0, 768  ;;  %p159_p2 = scmp.lt.s32.totalorder %s74_s0, %s74_s0 }
  0x28   :  { %66 = vst [vmem:[#allocation8 + $0x20] sm:$0xff] %v59_v4  ;;  %67 = vst [vmem:[#allocation8 + $0x28] sm:$0xff] %v61_v5  ;;  %p155_p1 = scmp.ne.s32.totalorder %s74_s0, %s154_s2  ;;  %p160_p3 = scmp.lt.s32.totalorder %s154_s2, %s154_s2 }
  0x2a   :  { %p161_p4 = por %p160_p3, %p159_p2 }
  0x2c   :  { %p162_p5 = pnand %p161_p4, %p155_p1 }
  0x2e   :  { %165 = shalt.err (!%p162_p5)
}
  0x2f   :  { %s186_s29 = smov 384   ;;  %s187_s30 = smov 24  }
  0x30   :  { %79 = dma.vmem_to_hbm [thread:$0]  %s74_s0, 768, %s223_s3, [#allocation4], %s186_s29, %s186_s29, %s187_s30  }
  0x31   :  { %178 = dma.done.wait [#allocation4], 768  }
  0x32   :  { %179 = vsyncadd [#allocation4], 4294966528 }
  0x33   :  { %83 = vsyncpa [#allocation3], 1 }
  0x34   :  { %84 = vsyncpa [#allocation6], 1 }
  0x35   :  { %85 = vsyncpa [#allocation4], 1 }

</bundles_post_ra>
